<compile_context>
chip_gen: v7x
topology: tpu7x:2x2x1
jax: 0.10.0
libtpu: 0.0.40
codegen_flags: <defaults>
</compile_context>

<pallas_src>
import math
import functools

import jax
import jax.numpy as jnp
from jax.experimental import pallas as pl
from jax.experimental.pallas import tpu as pltpu


def _pick_tile(dim, desired, align=8):
    """Largest tile <= desired that divides `dim` and is a multiple of `align`;
    falls back to the full dimension (always legal as a full-extent block)."""
    t = min(desired, dim)
    t = (t // align) * align
    while t >= align:
        if dim % t == 0:
            return t
        t -= align
    return dim


# ------------------------- tiled, pipelined matmul --------------------------

def _matmul_kernel(x_ref, w_ref, o_ref, acc_ref):
    @pl.when(pl.program_id(2) == 0)
    def _init():
        acc_ref[...] = jnp.zeros(acc_ref.shape, acc_ref.dtype)

    acc_ref[...] += jnp.dot(x_ref[...], w_ref[...],
                            preferred_element_type=jnp.float32)

    @pl.when(pl.program_id(2) == pl.num_programs(2) - 1)
    def _done():
        o_ref[...] = acc_ref[...].astype(o_ref.dtype)


def linear(x2d, w, *, out_dtype=None, tm=512, tn=512, tk=512,
           vmem_limit_bytes=None):
    """x2d: (M, K) bf16, w: (K, N) bf16 -> (M, N); K-tiled matmul, f32 VMEM acc.

    Default bf16 tiles use ~4-5 MiB VMEM (safe on v7x's 64 MiB / 2-TC budget).
    On v5e/v6e (128 MiB) tn can be raised to 1024-2048 with
    vmem_limit_bytes ~64-96 MiB to cut activation re-reads further.
    """
    M, K = x2d.shape
    K2, N = w.shape
    assert K == K2
    out_dtype = out_dtype or x2d.dtype
    tm = _pick_tile(M, tm, align=8)     # second-minor of x / out blocks
    tn = _pick_tile(N, tn, align=128)   # minor of w / out blocks
    tk = _pick_tile(K, tk, align=128)   # minor of x block, second-minor of w
    return pl.pallas_call(
        _matmul_kernel,
        out_shape=jax.ShapeDtypeStruct((M, N), out_dtype),
        grid=(M // tm, N // tn, K // tk),
        in_specs=[
            pl.BlockSpec((tm, tk), lambda i, j, k: (i, k)),
            pl.BlockSpec((tk, tn), lambda i, j, k: (k, j)),
        ],
        out_specs=pl.BlockSpec((tm, tn), lambda i, j, k: (i, j)),
        scratch_shapes=[pltpu.VMEM((tm, tn), jnp.float32)],
        compiler_params=pltpu.CompilerParams(
            dimension_semantics=("parallel", "parallel", "arbitrary"),
            vmem_limit_bytes=vmem_limit_bytes,
        ),
    )(x2d, w)


# ------------------------------- RoPE kernel --------------------------------

def _rope_kernel(x_ref, cos_ref, sin_ref, o_ref, *, lane_roll):
    x = x_ref[...].astype(jnp.float32)          # (ts, D)
    cos = cos_ref[...]                          # (ts, D) f32
    sin = sin_ref[...]                          # (ts, D) f32, sign/scale folded
    half = x.shape[-1] // 2
    if lane_roll:
        # half-rotation is symmetric, so roll direction is irrelevant; XLU op.
        rot = pltpu.roll(x, shift=half, axis=-1)
    else:
        rot = jnp.concatenate([x[:, half:], x[:, :half]], axis=-1)
    o_ref[...] = (x * cos + rot * sin).astype(o_ref.dtype)


def apply_rope(x, cos, sin, *, ts=512):
    """x: (B, NH, S, D) bf16; cos/sin: (S, D) f32 (sign of rotate_half folded
    into sin; any extra scale folded by the caller)."""
    B, NH, S, D = x.shape
    ts = _pick_tile(S, ts, align=8)
    kernel = functools.partial(_rope_kernel, lane_roll=(D % 128 == 0))
    return pl.pallas_call(
        kernel,
        out_shape=jax.ShapeDtypeStruct(x.shape, x.dtype),
        # seq-tile outermost: cos/sin block index is constant across the inner
        # B*NH sweep, so the tables stay VMEM-resident (no per-step re-DMA).
        grid=(S // ts, B, NH),
        in_specs=[
            pl.BlockSpec((None, None, ts, D), lambda s, b, h: (b, h, s, 0)),
            pl.BlockSpec((ts, D), lambda s, b, h: (s, 0)),
            pl.BlockSpec((ts, D), lambda s, b, h: (s, 0)),
        ],
        out_specs=pl.BlockSpec((None, None, ts, D), lambda s, b, h: (b, h, s, 0)),
        compiler_params=pltpu.CompilerParams(
            dimension_semantics=("parallel", "parallel", "parallel")),
    )(x, cos, sin)


# --------------------- GQA causal flash attention kernel --------------------

def _flash_attn_kernel(q_ref, k_ref, v_ref, o_ref, m_ref, l_ref, acc_ref, *,
                       groups, tq, tkv):
    # q_ref: (groups, tq, D) bf16; k_ref/v_ref: (tkv, D) bf16
    # o_ref: (groups, tq, D) bf16 output (written once, at the last kv tile)
    # m_ref/l_ref: (groups, tq, 1) f32; acc_ref: (groups, tq, D) f32
    qi = pl.program_id(2)
    ki = pl.program_id(3)

    @pl.when(ki == 0)
    def _init():
        m_ref[...] = jnp.full(m_ref.shape, -jnp.inf, m_ref.dtype)
        l_ref[...] = jnp.zeros(l_ref.shape, l_ref.dtype)
        acc_ref[...] = jnp.zeros(acc_ref.shape, acc_ref.dtype)

    # Skip KV tiles entirely above the causal diagonal. NOTE: this must stay
    # coupled with the jnp.minimum(j, i) clamp in the K/V index_maps (which
    # suppresses the DMA for exactly these skipped steps).
    @pl.when(ki <= qi)
    def _compute():
        q_start = qi * tq
        kv_start = ki * tkv
        row = q_start + jax.lax.broadcasted_iota(jnp.int32, (tq, tkv), 0)
        col = kv_start + jax.lax.broadcasted_iota(jnp.int32, (tq, tkv), 1)
        causal = col <= row
        k = k_ref[...]          # loaded once, shared by all q heads (GQA)
        v = v_ref[...]

        def body(g, carry):
            q = q_ref[g]        # (tq, D) bf16, already scaled by 1/sqrt(D)
            s = jax.lax.dot_general(q, k, (((1,), (1,)), ((), ())),
                                    preferred_element_type=jnp.float32)
            s = jnp.where(causal, s, -jnp.inf)
            m_prev = m_ref[g]
            m_new = jnp.maximum(m_prev, jnp.max(s, axis=-1, keepdims=True))
            alpha = jnp.exp(m_prev - m_new)
            p = jnp.exp(s - m_new)
            l_ref[g] = alpha * l_ref[g] + jnp.sum(p, axis=-1, keepdims=True)
            acc_ref[g] = alpha * acc_ref[g] + jnp.dot(
                p.astype(v.dtype), v, preferred_element_type=jnp.float32)
            m_ref[g] = m_new
            return carry

        # fori_loop bounds the live ranges of the (tq, tkv) f32 s/p temporaries
        # (a fully unrolled Python loop would not).
        jax.lax.fori_loop(0, groups, body, 0)

    @pl.when(ki == pl.num_programs(3) - 1)
    def _finalize():
        def fin(g, carry):
            o_ref[g] = (acc_ref[g] *
                        pl.reciprocal(l_ref[g], approx=True)).astype(o_ref.dtype)
            return carry
        jax.lax.fori_loop(0, groups, fin, 0)


def gqa_causal_flash_attention(q, k, v, *, tile_q=256, tile_kv=256,
                               vmem_limit_bytes=None):
    """q: (B, nH, S, D) bf16 (RoPE'd, pre-scaled); k, v: (B, nKV, S, D) bf16."""
    B, nH, S, D = q.shape
    nKV = k.shape[1]
    assert nH % nKV == 0
    groups = nH // nKV
    t = _pick_tile(S, min(tile_q, tile_kv), align=8)
    tq = tkv = t   # equal tiles guarantee no fully-masked row in processed tiles
    kernel = functools.partial(_flash_attn_kernel, groups=groups, tq=tq, tkv=tkv)

    # K/V index clamp: for j > i the compute is skipped (pl.when above), so
    # mapping those steps to the already-fetched block index i avoids DMAing
    # causally-masked tiles (~half the K/V HBM traffic).
    kv_map = lambda b, h, i, j: (b, h, jnp.minimum(j, i), 0)

    return pl.pallas_call(
        kernel,
        out_shape=jax.ShapeDtypeStruct((B, nH, S, D), jnp.bfloat16),
        grid=(B, nKV, S // tq, S // tkv),
        in_specs=[
            pl.BlockSpec((None, groups, tq, D), lambda b, h, i, j: (b, h, i, 0)),
            pl.BlockSpec((None, None, tkv, D), kv_map),
            pl.BlockSpec((None, None, tkv, D), kv_map),
        ],
        out_specs=pl.BlockSpec((None, groups, tq, D),
                               lambda b, h, i, j: (b, h, i, 0)),
        scratch_shapes=[
            pltpu.VMEM((groups, tq, 1), jnp.float32),   # running max m
            pltpu.VMEM((groups, tq, 1), jnp.float32),   # running denom l
            pltpu.VMEM((groups, tq, D), jnp.float32),   # f32 output accumulator
        ],
        compiler_params=pltpu.CompilerParams(
            dimension_semantics=("parallel", "parallel", "parallel", "arbitrary"),
            vmem_limit_bytes=vmem_limit_bytes,
        ),
    )(q, k, v)


# ------------------------------- module wrapper ------------------------------

class LlamaAttentionPallas:
    """Pallas-TPU forward of LlamaAttentionExperimental (attention path only)."""

    def __init__(self, hidden_size, num_heads, num_kv_heads,
                 rope_theta=10000.0, key=jax.random.PRNGKey(0),
                 param_dtype=jnp.bfloat16):
        assert hidden_size % num_heads == 0
        assert num_heads % num_kv_heads == 0
        self.hidden_size = hidden_size
        self.num_heads = num_heads
        self.num_kv_heads = num_kv_heads
        self.head_dim = hidden_size // num_heads
        assert self.head_dim % 2 == 0
        self.rope_theta = rope_theta
        self.param_dtype = param_dtype

        k1, k2, k3, k4 = jax.random.split(key, 4)

        def init(k, fan_in, fan_out):
            bound = 1.0 / math.sqrt(fan_in)
            return jax.random.uniform(k, (fan_in, fan_out), jnp.float32,
                                      -bound, bound)

        # attention_bias=False (Llama default) -> no biases; weights stored (in, out)
        wq = init(k1, hidden_size, num_heads * self.head_dim)
        wk = init(k2, hidden_size, num_kv_heads * self.head_dim)
        wv = init(k3, hidden_size, num_kv_heads * self.head_dim)
        # fused QKV weight (bf16): activation tile read from HBM once, MXU at
        # full bf16 rate with f32 accumulation.
        self.w_qkv = jnp.concatenate([wq, wk, wv], axis=1).astype(param_dtype)
        self.wo = init(k4, num_heads * self.head_dim, hidden_size).astype(param_dtype)

    def rope_tables(self, S):
        """Returns (cos, sin_signed), both (S, D) f32.  The rotate_half sign
        pattern [-1]*half + [+1]*half is folded into sin so the kernel only
        needs a half-lane swap (roll/concat) plus 2 muls + 1 add."""
        D = self.head_dim
        inv_freq = 1.0 / (self.rope_theta **
                          (jnp.arange(0, D, 2, dtype=jnp.float32) / D))
        pos = jnp.arange(S, dtype=jnp.float32)
        freqs = pos[:, None] * inv_freq[None, :]          # (S, D/2)
        emb = jnp.concatenate([freqs, freqs], axis=-1)    # (S, D)
        sign = jnp.concatenate([-jnp.ones((D // 2,), jnp.float32),
                                jnp.ones((D // 2,), jnp.float32)])
        return jnp.cos(emb), jnp.sin(emb) * sign

    def __call__(self, hidden_states):
        B, S, H = hidden_states.shape
        nH, nKV, D = self.num_heads, self.num_kv_heads, self.head_dim
        x2d = hidden_states.astype(self.param_dtype).reshape(B * S, H)

        # fused q/k/v projection: one tiled, pipelined bf16 matmul (f32 acc)
        qkv = linear(x2d, self.w_qkv)                      # bf16 (B*S, (nH+2nKV)*D)
        qkv = qkv.reshape(B, S, nH + 2 * nKV, D)
        q = qkv[:, :, :nH, :].transpose(0, 2, 1, 3)        # (B, nH, S, D)
        k = qkv[:, :, nH:nH + nKV, :].transpose(0, 2, 1, 3)
        v = qkv[:, :, nH + nKV:, :].transpose(0, 2, 1, 3)
        # TODO(synk): fold these head-major transposes (and the output-side one)
        #             into BlockSpec index_maps; needs head_dim-aligned minor
        #             blocks, so it is a large-shape (D>=128) layout follow-up.

        cos, sin_signed = self.rope_tables(S)
        scale = 1.0 / math.sqrt(D)
        # RoPE once per head (hoisted out of attention); 1/sqrt(D) folded into
        # q's cos/sin tables so no O(S^2) score scaling happens in attention.
        q = apply_rope(q, cos * scale, sin_signed * scale)
        k = apply_rope(k, cos, sin_signed)

        attn = gqa_causal_flash_attention(q, k, v)         # (B, nH, S, D) bf16

        attn2d = attn.transpose(0, 2, 1, 3).reshape(B * S, H)
        out = linear(attn2d, self.wo, out_dtype=jnp.float32).reshape(B, S, H)
        # reference returns (attn_output, None, None)
        return out, None, None


# ---------------------------------- self test --------------------------------

def _reference_forward(module, hidden_states):
    """Pure-JAX f32 reference (same bf16 weights, f32 math) for a sanity check."""
    B, S, H = hidden_states.shape
    nH, nKV, D = module.num_heads, module.num_kv_heads, module.head_dim
    groups = nH // nKV
    w_qkv = module.w_qkv.astype(jnp.float32)
    wo = module.wo.astype(jnp.float32)
    x = hidden_states.reshape(B * S, H)
    qkv = (x @ w_qkv).reshape(B, S, nH + 2 * nKV, D)
    q = qkv[:, :, :nH].transpose(0, 2, 1, 3)
    k = qkv[:, :, nH:nH + nKV].transpose(0, 2, 1, 3)
    v = qkv[:, :, nH + nKV:].transpose(0, 2, 1, 3)
    cos, sin_signed = module.rope_tables(S)
    half = D // 2
    sin = jnp.concatenate([-sin_signed[:, :half], sin_signed[:, half:]], axis=-1)

    def rope(t):
        rot = jnp.concatenate([-t[..., half:], t[..., :half]], axis=-1)
        return t * cos + rot * sin

    q, k = rope(q), rope(k)
    k = jnp.repeat(k, groups, axis=1)
    v = jnp.repeat(v, groups, axis=1)
    s = jnp.einsum("bhqd,bhkd->bhqk", q, k) / math.sqrt(D)
    mask = jnp.tril(jnp.ones((S, S), dtype=bool))
    s = jnp.where(mask, s, -jnp.inf)
    p = jax.nn.softmax(s, axis=-1)
    o = jnp.einsum("bhqk,bhkd->bhqd", p, v)
    o = o.transpose(0, 2, 1, 3).reshape(B * S, H)
    return (o @ wo).reshape(B, S, H)


if __name__ == "__main__":
    B, S, H, nH, nKV = 2, 8, 32, 4, 2
    key = jax.random.PRNGKey(0)
    kx, kw = jax.random.split(key)
    hidden_states = jax.random.normal(kx, (B, S, H), dtype=jnp.float32)

    module = LlamaAttentionPallas(H, nH, nKV, key=kw)
    out, _, _ = module(hidden_states)
    jax.block_until_ready(out)
    assert out.shape == (B, S, H)
    assert bool(jnp.all(jnp.isfinite(out)))

    ref = _reference_forward(module, hidden_states)
    max_err = float(jnp.max(jnp.abs(out - ref)))
    # bf16 MXU operands vs f32 reference: allow ~bf16-level end-to-end error.
    assert jnp.allclose(out, ref, rtol=5e-2, atol=3e-2), (
        "max abs err = %f" % max_err)
    print("KERNEL_OK")
</pallas_src>

<mosaic_0001>
module attributes {stable_mosaic.version = 11 : i64} {
  func.func @_matmul_kernel(%arg0: i32, %arg1: i32, %arg2: i32, %arg3: memref<16x32xbf16, #tpu.memory_space<vmem>>, %arg4: memref<32x64xbf16, #tpu.memory_space<vmem>>, %arg5: memref<16x64xbf16, #tpu.memory_space<vmem>>, %arg6: memref<16x64xf32, #tpu.memory_space<vmem>>) attributes {dimension_semantics = [#tpu.dimension_semantics<parallel>, #tpu.dimension_semantics<parallel>, #tpu.dimension_semantics<arbitrary>], iteration_bounds = array<i64: 1, 1, 1>, scalar_prefetch = 0 : i64, scratch_operands = 1 : i64, tpu.core_type = #tpu.core_type<tc>, window_params = [{transform_indices = @transform_0, window_bounds = array<i64: 16, 32>}, {transform_indices = @transform_1, window_bounds = array<i64: 32, 64>}, {transform_indices = @transform_2, window_bounds = array<i64: 16, 64>}]} {
    %c0_i32 = arith.constant 0 : i32
    %0 = arith.cmpi eq, %arg2, %c0_i32 : i32
    %1 = arith.extui %0 : i1 to i32
    %c0_i32_0 = arith.constant 0 : i32
    %2 = arith.cmpi ne, %1, %c0_i32_0 : i32
    scf.if %2 {
      %cst_10 = arith.constant 0.000000e+00 : f32
      %12 = vector.broadcast %cst_10 : f32 to vector<16x64xf32>
      %c0_11 = arith.constant 0 : index
      %c0_12 = arith.constant 0 : index
      %13 = vector.load %arg6[%c0_11, %c0_12] : memref<16x64xf32, #tpu.memory_space<vmem>>, vector<16x64xf32>
      tpu.vector_store %arg6[%c0_11, %c0_12], %12 {strides = array<i32>} : memref<16x64xf32, #tpu.memory_space<vmem>>, vector<16x64xf32>,
    } else {
    }
    %c0 = arith.constant 0 : index
    %c0_1 = arith.constant 0 : index
    %3 = vector.load %arg6[%c0, %c0_1] : memref<16x64xf32, #tpu.memory_space<vmem>>, vector<16x64xf32>
    %c0_2 = arith.constant 0 : index
    %c0_3 = arith.constant 0 : index
    %4 = vector.load %arg3[%c0_2, %c0_3] : memref<16x32xbf16, #tpu.memory_space<vmem>>, vector<16x32xbf16>
    %c0_4 = arith.constant 0 : index
    %c0_5 = arith.constant 0 : index
    %5 = vector.load %arg4[%c0_4, %c0_5] : memref<32x64xbf16, #tpu.memory_space<vmem>>, vector<32x64xbf16>
    %cst = arith.constant dense<0.000000e+00> : vector<16x64xf32>
    %6 = tpu.matmul %4, %5, %cst {dimension_numbers = #tpu.dot_dimension_numbers<[1], [0], [0], [1], [0, 0, 1, 1], [], []>} : vector<16x32xbf16>, vector<32x64xbf16>, vector<16x64xf32> -> vector<16x64xf32>
    %7 = arith.addf %3, %6 : vector<16x64xf32>
    %c0_6 = arith.constant 0 : index
    %c0_7 = arith.constant 0 : index
    %8 = vector.load %arg6[%c0_6, %c0_7] : memref<16x64xf32, #tpu.memory_space<vmem>>, vector<16x64xf32>
    tpu.vector_store %arg6[%c0_6, %c0_7], %7 {strides = array<i32>} : memref<16x64xf32, #tpu.memory_space<vmem>>, vector<16x64xf32>,
    %c0_i32_8 = arith.constant 0 : i32
    %9 = arith.cmpi eq, %arg2, %c0_i32_8 : i32
    %10 = arith.extui %9 : i1 to i32
    %c0_i32_9 = arith.constant 0 : i32
    %11 = arith.cmpi ne, %10, %c0_i32_9 : i32
    scf.if %11 {
      %c0_10 = arith.constant 0 : index
      %c0_11 = arith.constant 0 : index
      %12 = vector.load %arg6[%c0_10, %c0_11] : memref<16x64xf32, #tpu.memory_space<vmem>>, vector<16x64xf32>
      %13 = arith.truncf %12 : vector<16x64xf32> to vector<16x64xbf16>
      %c0_12 = arith.constant 0 : index
      %c0_13 = arith.constant 0 : index
      %14 = vector.load %arg5[%c0_12, %c0_13] : memref<16x64xbf16, #tpu.memory_space<vmem>>, vector<16x64xbf16>
      tpu.vector_store %arg5[%c0_12, %c0_13], %13 {strides = array<i32>} : memref<16x64xbf16, #tpu.memory_space<vmem>>, vector<16x64xbf16>,
    } else {
    }
    return
  }
  func.func @transform_0(%arg0: i32, %arg1: i32, %arg2: i32) -> (i32, i32) {
    %c0_i32 = arith.constant 0 : i32
    return %arg0, %arg2 : i32, i32
  }
  func.func @transform_1(%arg0: i32, %arg1: i32, %arg2: i32) -> (i32, i32) {
    %c0_i32 = arith.constant 0 : i32
    return %arg2, %arg1 : i32, i32
  }
  func.func @transform_2(%arg0: i32, %arg1: i32, %arg2: i32) -> (i32, i32) {
    %c0_i32 = arith.constant 0 : i32
    return %arg0, %arg1 : i32, i32
  }
}

</mosaic_0001>

<bundles_post_ra>
// kernel: tpu_custom_call.1
= control target key start
LH: loop header
LB: loop body
LE: loop exit
PB: predicated region body
PF: predicated region fallthrough
CT: control target
= control target key end

     0   :  { %7 = vsyncpa [#allocation4], 0  ;;  %s329_s0 = inlined_call_operand.hbm [shape: bf16[16,32], index: 0, kind: input, shape index: {}]   ;;  %s330_s1 = inlined_call_operand.hbm [shape: bf16[32,64], index: 1, kind: input, shape index: {}]   ;;  %s331_s2 = inlined_call_operand.hbm [shape: bf16[16,64], index: 2, kind: output, shape index: {}]  }
   0x1   :  { %8 = vsyncpa [#allocation7], 0 }
   0x2   :  { %9 = vsyncpa [#allocation5], 0  ;;  %s258_s9 = smov [#allocation3]   ;;  %s186_s13 = scalar_lea.hbm %s329_s0, 128 }
   0x3   :  { %s15_s10 = sshll.u32 %s258_s9, 4  ;;  %p187_p0 = scmp.ne.s32.totalorder %s329_s0, %s186_s13  ;;  %s16_s10 = int_to_ptr.vmem [resolvable:$true] %s15_s10 }
   0x4   :  { %p190_p1 = scmp.lt.u32.totalorder %s186_s13, %s329_s0 }
   0x6   :  { %p192_p2 = pnand %p190_p1, %p187_p0 }
   0x8   :  { %195 = shalt.err (!%p192_p2)
}
   0x9   :  { %s196_s18 = scalar_lea.vmem %s16_s10, 128  ;;  %p201_p4 = scmp.lt.s32.totalorder %s16_s10, %s16_s10 }
   0xa   :  { %p197_p3 = scmp.ne.s32.totalorder %s16_s10, %s196_s18  ;;  %p202_p5 = scmp.lt.s32.totalorder %s196_s18, %s196_s18 }
   0xc   :  { %p203_p6 = por %p202_p5, %p201_p4 }
   0xe   :  { %p204_p7 = pnand %p203_p6, %p197_p3 }
  0x10   :  { %207 = shalt.err (!%p204_p7)
}
  0x11   :  { %s259_s19 = smov 64   ;;  %s260_s20 = smov 4  }
  0x12   :  { %21 = dma.hbm_to_vmem [thread:$0]  %s329_s0, 128, %s16_s10, [#allocation4], %s259_s19, %s259_s19, %s260_s20  }
  0x13   :  { %s261_s23 = smov [#allocation6]   ;;  %s208_s27 = scalar_lea.hbm %s330_s1, 256 }
  0x14   :  { %s27_s24 = sshll.u32 %s261_s23, 4  ;;  %p209_p8 = scmp.ne.s32.totalorder %s330_s1, %s208_s27  ;;  %s28_s24 = int_to_ptr.vmem [resolvable:$true] %s27_s24 }
  0x15   :  { %p212_p9 = scmp.lt.u32.totalorder %s208_s27, %s330_s1 }
  0x17   :  { %p214_p10 = pnand %p212_p9, %p209_p8 }
  0x19   :  { %217 = shalt.err (!%p214_p10)
}
  0x1a   :  { %s218_s4 = scalar_lea.vmem %s28_s24, 256  ;;  %p223_p12 = scmp.lt.s32.totalorder %s28_s24, %s28_s24 }
  0x1b   :  { %p219_p11 = scmp.ne.s32.totalorder %s28_s24, %s218_s4  ;;  %p224_p13 = scmp.lt.s32.totalorder %s218_s4, %s218_s4 }
  0x1d   :  { %p225_p0 = por %p224_p13, %p223_p12 }
  0x1f   :  { %p226_p1 = pnand %p225_p0, %p219_p11 }
  0x21   :  { %229 = shalt.err (!%p226_p1)
}
  0x22   :  { %33 = dma.hbm_to_vmem [thread:$0]  %s330_s1, 256, %s28_s24, [#allocation7], %s259_s19, %s259_s19, %s260_s20  }
  0x23   :  { %252 = dma.done.wait [#allocation4], 128  }
  0x24   :  { %253 = vsyncadd [#allocation4], 4294967168 }
  0x25   :  { %254 = dma.done.wait [#allocation7], 256  }
  0x26   :  { %255 = vsyncadd [#allocation7], 4294967040  ;;  %vm45_vm0 = vcmask 523264   ;;  %v262_v0 = vmov 0.0   ;;  %vm263_vm1 = vmmov 0   ;;  %v183_v1 = vld [vmem:[#allocation6] sm:$0xff]  }
  0x27   :  { %46 = vst.msk [vmem:[#allocation2] sm:$0xff] %vm45_vm0, %v262_v0  ;;  %47 = vst.msk [vmem:[#allocation2 + $0x8] sm:$0xff] %vm45_vm0, %v262_v0  ;;  %168 = vmatprep.subr.bf16.mxu0 %v262_v0  ;;  %172 = vmatprep.mubr.msk.bf16.mxu0 %vm263_vm1, %v262_v0  ;;  %v184_v2 = vld [vmem:[#allocation6 + $0x8] sm:$0xff]   ;;  %v185_v3 = vld [vmem:[#allocation3] sm:$0xff]   ;;  %vm73_vm2 = vcmask 261120   ;;  %vm136_vm3 = vcmask 519168  }
  0x28   :  { %169 = vmatpush3.bf16.msra.mxu0 %v183_v1  ;;  %s264_s1 = smov [#allocation8]  }
  0x29   :  { %170 = vmatprep.subr.bf16.mxu0 %v262_v0  ;;  %s144_s6 = sshll.u32 %s264_s1, 4  ;;  %s145_s6 = int_to_ptr.vmem [resolvable:$true] %s144_s6 }
  0x2a   :  { %s230_s7 = scalar_lea.vmem %s145_s6, 128  ;;  %p235_p3 = scmp.lt.s32.totalorder %s145_s6, %s145_s6 }
  0x2b   :  { %p231_p2 = scmp.ne.s32.totalorder %s145_s6, %s230_s7  ;;  %p236_p4 = scmp.lt.s32.totalorder %s230_s7, %s230_s7 }
  0x2c   :  { %171 = vmatpush3.bf16.msra.mxu0 %v184_v2 }
  0x2d   :  { %p237_p5 = por %p236_p4, %p235_p3 }
  0x2e   :  { %v48_v4 = vld [vmem:[#allocation2] sm:$0xff]  ;;  %v49_v6 = vld [vmem:[#allocation2 + $0x8] sm:$0xff] }
  0x2f   :  { %173 = vmatmul.mubr.msk.bf16.vlgmr.msra.gmra.mrb[0].mxu0 %vm73_vm2, %v185_v3  ;;  %p238_p6 = pnand %p237_p5, %p231_p2 }
 0x102   :  { %v111_v5 = vpop.f32.mrb[0].mxu0 }
 0x103   :  { %v118_v7 = vadd.f32 %v111_v5, %v48_v4  ;;  %v174_v8 = vpop.f32.mrb[1].mxu0 }
 0x104   :  { %v114_v9 = vpop.f32.mrb[2].mxu0 }
 0x105   :  { %121 = vst.msk [vmem:[#allocation2] sm:$0xff] %vm45_vm0, %v118_v7  ;;  %v119_v10 = vadd.f32 %v114_v9, %v49_v6  ;;  %v175_v11 = vpop.f32.mrb[3].mxu0 }
 0x107   :  { %122 = vst.msk [vmem:[#allocation2 + $0x8] sm:$0xff] %vm45_vm0, %v119_v10 }
 0x10c   :  { %v126_v12 = vld [vmem:[#allocation2] sm:$0xff] }
 0x10d   :  { %v163_v13 = vpack.c.bf16 %v126_v12, %v126_v12 }
 0x10e   :  { %v127_v14 = vld [vmem:[#allocation2 + $0x8] sm:$0xff] }
 0x10f   :  { %v164_v15 = vpack.c.bf16 %v127_v14, %v127_v14  ;;  %137 = vst.msk [vmem:[#allocation8] sm:$0xf] %vm136_vm3, %v163_v13 }
 0x111   :  { %138 = vst.msk [vmem:[#allocation8 + $0x4] sm:$0xf] %vm136_vm3, %v164_v15 }
 0x112   :  { %241 = shalt.err (!%p238_p6)
}
 0x113   :  { %s242_s10 = scalar_lea.hbm %s331_s2, 128 }
 0x114   :  { %p243_p7 = scmp.ne.s32.totalorder %s331_s2, %s242_s10  ;;  %p246_p8 = scmp.lt.u32.totalorder %s242_s10, %s331_s2 }
 0x116   :  { %p248_p9 = pnand %p246_p8, %p243_p7 }
 0x118   :  { %251 = shalt.err (!%p248_p9)
}
 0x119   :  { %150 = dma.vmem_to_hbm [thread:$0]  %s145_s6, 128, %s331_s2, [#allocation5], %s259_s19, %s259_s19, %s260_s20  }
 0x11a   :  { %256 = dma.done.wait [#allocation5], 128  }
 0x11b   :  { %257 = vsyncadd [#allocation5], 4294967168 }
 0x11c   :  { %154 = vsyncpa [#allocation4], 1 }
 0x11d   :  { %155 = vsyncpa [#allocation7], 1 }
 0x11e   :  { %156 = vsyncpa [#allocation5], 1 }

</bundles_post_ra>
